<compile_context>
chip_gen: v7x
topology: tpu7x:2x2x1
jax: 0.10.0
libtpu: 0.0.40
codegen_flags: <defaults>
</compile_context>

<pallas_src>
import jax
import jax.numpy as jnp
from jax import lax
from jax.experimental import pallas as pl
from jax.experimental.pallas import tpu as pltpu


def _pw_conv_bn_relu_kernel(x_ref, w_ref, shift_ref, o_ref):
    """Fused 1x1-conv (channel matmul) + BN shift + ReLU.

    x_ref:     (1, K, tm)     input pixels, channels-first; tm on lanes
    w_ref:     (Cout, K)      BN-scale-folded weights
    shift_ref: (Cout, 1)      BN shift (f32)
    o_ref:     (1, Cout, tm)  output, channels-first (NCHW-flat) -> lane-dense store
    """
    y = jnp.dot(w_ref[...], x_ref[0], preferred_element_type=jnp.float32)
    o_ref[0] = jnp.maximum(y + shift_ref[...], 0.0).astype(o_ref.dtype)


def _vmem_budget():
    """Generation-aware VMEM sizing.

    v5e/v6e (128 MiB VMEM): vmem_limit 64 MiB, block budget 32 MiB.
    v7x (64 MiB / TensorCore) or unknown: vmem_limit 32 MiB, budget 16 MiB.
    """
    cap = 64 << 20  # conservative (v7x-safe) fallback
    try:
        cap = int(getattr(pltpu.get_tpu_info(), "vmem_capacity_bytes", cap))
    except Exception:
        pass
    vmem_limit = int(min(cap // 2, 64 << 20))
    return vmem_limit // 2, vmem_limit


def _pick_m_tile(m, n_batch, k, c_out, itemsize, budget):
    """Lane tile over the flattened pixel axis.

    Multiple of 128 (lane-dense, unmasked stores) unless m <= 128, sized so the
    double-buffered block footprint (2x input + 2x output + f32 temps) fits
    `budget`, and split further for batch-1 inputs so the 'parallel' grid has
    at least 2 steps (v7x: 2 TensorCores)."""
    if m <= 128:
        return m  # single block == full extent (always legal)
    per_col = 2 * k * itemsize + 2 * c_out * itemsize + 2 * c_out * 4
    cap = max(128, (budget // max(per_col, 1)) // 128 * 128)
    tm = min((m // 128) * 128, cap)
    if n_batch * pl.cdiv(m, tm) < 2:
        half = (((m + 1) // 2) + 127) // 128 * 128
        tm = max(128, min(tm, half))
    return tm


def pointwise_conv_bn_relu(x3, w_t, shift):
    """x3: (N, K, M) channels-first pixel matrix; w_t: (Cout, K) BN-scale-folded
    weights; shift: (Cout,) f32.  Returns (N, Cout, M) in the input dtype."""
    N, K, M = x3.shape
    Cout = w_t.shape[0]
    itemsize = jnp.dtype(x3.dtype).itemsize
    block_budget, vmem_limit = _vmem_budget()
    tm = _pick_m_tile(M, N, K, Cout, itemsize, block_budget)
    grid = (N, pl.cdiv(M, tm))

    return pl.pallas_call(
        _pw_conv_bn_relu_kernel,
        out_shape=jax.ShapeDtypeStruct((N, Cout, M), x3.dtype),
        grid=grid,
        in_specs=[
            pl.BlockSpec((1, K, tm), lambda n, m: (n, 0, m)),
            pl.BlockSpec((Cout, K), lambda n, m: (0, 0)),
            pl.BlockSpec((Cout, 1), lambda n, m: (0, 0)),
        ],
        out_specs=pl.BlockSpec((1, Cout, tm), lambda n, m: (n, 0, m)),
        compiler_params=pltpu.CompilerParams(
            dimension_semantics=("parallel", "parallel"),
            vmem_limit_bytes=vmem_limit),
    )(x3, w_t.astype(x3.dtype), shift.reshape(Cout, 1).astype(jnp.float32))


def _bn_fold(gamma, beta, mean, var, eps=1e-5):
    scale = gamma / jnp.sqrt(var + eps)
    shift = beta - mean * scale
    return scale.astype(jnp.float32), shift.astype(jnp.float32)


class FactorizedReduce:
    """JAX/Pallas port of FactorizedReduce (slimmable, ratio=(1.0, 1.0)).

    BatchNorm runs in inference mode: running stats are folded into a
    per-channel scale (merged into the conv weights) and shift (added in-kernel).
    """

    def __init__(self, C_in, C_out, stride=1, slimmable=True, key=None):
        assert stride in (1, 2)
        assert C_out % 2 == 0
        self.C_in, self.C_out = C_in, C_out
        self.stride, self.slimmable = stride, slimmable

        if stride == 1 and not slimmable:
            return  # identity path, no parameters

        key = jax.random.PRNGKey(0) if key is None else key
        k1, k2 = jax.random.split(key)

        c = jnp.arange(C_out, dtype=jnp.float32)
        self.scale, self.shift = _bn_fold(1.0 + 0.1 * c, 0.05 * c,
                                          0.01 * c, 1.0 + 0.02 * c)
        # TODO(synk): training-mode NaiveSyncBatchNorm (batch statistics +
        # cross-replica sync) is not reproduced; inference-mode BN is used.

        if stride == 1:
            w1_oihw = 0.1 * jax.random.normal(k1, (C_out, C_in, 1, 1), jnp.float32)
            self.w1 = w1_oihw[:, :, 0, 0].T                    # (Cin, Cout)
            self.w_kernel = (self.w1 * self.scale[None, :]).T  # (Cout, Cin)
        else:  # stride == 2
            Ch = C_out // 2
            w1_oihw = 0.1 * jax.random.normal(k1, (Ch, C_in, 1, 1), jnp.float32)
            w2_oihw = 0.1 * jax.random.normal(k2, (Ch, C_in, 1, 1), jnp.float32)
            self.w1 = w1_oihw[:, :, 0, 0].T                    # (Cin, Ch)
            self.w2 = w2_oihw[:, :, 0, 0].T                    # (Cin, Ch)
            # Only the two offsets the reference actually samples are kept:
            #   rows [0     : Cin ]  pixel (2i,   2j)   -> conv1 -> out[:Ch]
            #   rows [Cin   : 2Cin]  pixel (2i+1, 2j+1) -> conv2 -> out[Ch:]
            # (no dead zero-weight offsets, half the K of the old layout).
            wbd = jnp.zeros((2 * C_in, C_out), jnp.float32)
            wbd = wbd.at[:C_in, :Ch].set(self.w1)
            wbd = wbd.at[C_in:, Ch:].set(self.w2)
            self.w_kernel = (wbd * self.scale[None, :]).T      # (Cout, 2*Cin)

        self._forward = jax.jit(self._forward_impl)

    def _forward_impl(self, x_nchw):
        N, C, H, W = x_nchw.shape
        if self.stride == 1:
            # 1x1 conv: channels-first matmul layout is a free reshape of NCHW;
            # the kernel writes NCHW-flat directly (no transposes, no padding).
            x3 = x_nchw.reshape(N, C, H * W)
            out = pointwise_conv_bn_relu(x3, self.w_kernel, self.shift)
            return out.reshape(N, self.C_out, H, W)
        # stride == 2: both offset 1x1/s2 convs + concat fused into one matmul.
        # Only the two used offsets are gathered (single fused XLA pass).
        Ho, Wo = H // 2, W // 2
        x6 = x_nchw.reshape(N, C, Ho, 2, Wo, 2)
        x00 = x6[:, :, :, 0, :, 0].reshape(N, C, Ho * Wo)   # pixels (2i,   2j)   -> conv1
        x11 = x6[:, :, :, 1, :, 1].reshape(N, C, Ho * Wo)   # pixels (2i+1, 2j+1) -> conv2
        x3 = jnp.concatenate([x00, x11], axis=1)            # (N, 2*Cin, Ho*Wo)
        out = pointwise_conv_bn_relu(x3, self.w_kernel, self.shift)
        return out.reshape(N, self.C_out, Ho, Wo)

    def __call__(self, x_nchw):
        N, C, H, W = x_nchw.shape
        assert C == self.C_in
        if self.stride == 1 and not self.slimmable:
            return x_nchw
        if self.stride == 2:
            assert H % 2 == 0 and W % 2 == 0, "stride=2 FactorizedReduce needs even H, W"
        return self._forward(x_nchw)


def _reference(x_nchw, mod):
    """Pure-JAX reference (lax.conv_general_dilated) for verification."""
    if mod.stride == 1 and not mod.slimmable:
        return x_nchw
    x = jnp.transpose(x_nchw, (0, 2, 3, 1))
    dn = ("NHWC", "HWIO", "NHWC")
    prec = lax.Precision.HIGHEST
    if mod.stride == 1:
        w = mod.w1.reshape(1, 1, mod.C_in, mod.C_out)
        y = lax.conv_general_dilated(x, w, (1, 1), "VALID",
                                     dimension_numbers=dn, precision=prec)
    else:
        Ch = mod.C_out // 2
        w1 = mod.w1.reshape(1, 1, mod.C_in, Ch)
        w2 = mod.w2.reshape(1, 1, mod.C_in, Ch)
        y1 = lax.conv_general_dilated(x, w1, (2, 2), "VALID",
                                      dimension_numbers=dn, precision=prec)
        y2 = lax.conv_general_dilated(x[:, 1:, 1:, :], w2, (2, 2), "VALID",
                                      dimension_numbers=dn, precision=prec)
        y = jnp.concatenate([y1, y2], axis=-1)
    y = y * mod.scale[None, None, None, :] + mod.shift[None, None, None, :]
    y = jnp.maximum(y, 0.0)
    return jnp.transpose(y, (0, 3, 1, 2))


if __name__ == "__main__":
    key = jax.random.PRNGKey(0)
    kx, kx2, kp = jax.random.split(key, 3)

    N, C_in, C_out, H, W = 2, 4, 8, 16, 16
    x = jax.random.normal(kx, (N, C_in, H, W), jnp.float32)
    # Second shape exercises multi-tile M, a partial (masked) last block and the
    # batch-1 grid split for the 2-TensorCore case.
    x2 = jax.random.normal(kx2, (1, C_in, 24, 24), jnp.float32)

    ok = True
    for stride in (1, 2):
        mod = FactorizedReduce(C_in, C_out, stride=stride, key=kp)
        for xi in (x, x2):
            out = jax.block_until_ready(mod(xi))
            ref = _reference(xi, mod)
            n, _, h, w = xi.shape
            ho = h if stride == 1 else h // 2
            assert out.shape == (n, C_out, ho, ho), out.shape
            ok = ok and bool(jnp.allclose(out, ref, atol=1e-4, rtol=1e-4))

    # identity path (stride=1, slimmable=False) passes the input through
    ident = FactorizedReduce(C_in, C_in, stride=1, slimmable=False)
    ok = ok and bool(jnp.array_equal(ident(x), x))

    if ok:
        print("KERNEL_OK")
</pallas_src>

<mosaic_0001>
module attributes {stable_mosaic.version = 11 : i64} {
  func.func @_pw_conv_bn_relu_kernel(%arg0: i32, %arg1: i32, %arg2: memref<1x4x256xf32, #tpu.memory_space<vmem>>, %arg3: memref<8x4xf32, #tpu.memory_space<vmem>>, %arg4: memref<8x1xf32, #tpu.memory_space<vmem>>, %arg5: memref<1x8x256xf32, #tpu.memory_space<vmem>>) attributes {dimension_semantics = [#tpu.dimension_semantics<parallel>, #tpu.dimension_semantics<parallel>], iteration_bounds = array<i64: 2, 1>, scalar_prefetch = 0 : i64, scratch_operands = 0 : i64, tpu.core_type = #tpu.core_type<tc>, window_params = [{transform_indices = @transform_0, window_bounds = array<i64: 1, 4, 256>}, {pipeline_mode = #tpu.pipeline_mode<synchronous>, transform_indices = @transform_1, window_bounds = array<i64: 8, 4>}, {pipeline_mode = #tpu.pipeline_mode<synchronous>, transform_indices = @transform_2, window_bounds = array<i64: 8, 1>}, {transform_indices = @transform_3, window_bounds = array<i64: 1, 8, 256>}]} {
    %c0 = arith.constant 0 : index
    %c0_0 = arith.constant 0 : index
    %0 = vector.load %arg3[%c0, %c0_0] : memref<8x4xf32, #tpu.memory_space<vmem>>, vector<8x4xf32>
    %c0_1 = arith.constant 0 : index
    %c0_2 = arith.constant 0 : index
    %c0_3 = arith.constant 0 : index
    %1 = vector.load %arg2[%c0_1, %c0_2, %c0_3] : memref<1x4x256xf32, #tpu.memory_space<vmem>>, vector<1x4x256xf32>
    %2 = vector.shape_cast %1 : vector<1x4x256xf32> to vector<4x256xf32>
    %cst = arith.constant dense<0.000000e+00> : vector<8x256xf32>
    %3 = tpu.matmul %0, %2, %cst {dimension_numbers = #tpu.dot_dimension_numbers<[1], [0], [0], [1], [0, 0, 1, 1], [], []>} : vector<8x4xf32>, vector<4x256xf32>, vector<8x256xf32> -> vector<8x256xf32>
    %c0_4 = arith.constant 0 : index
    %c0_5 = arith.constant 0 : index
    %4 = vector.load %arg4[%c0_4, %c0_5] : memref<8x1xf32, #tpu.memory_space<vmem>>, vector<8x1xf32>
    %5 = vector.broadcast %4 : vector<8x1xf32> to vector<8x256xf32>
    %6 = arith.addf %3, %5 : vector<8x256xf32>
    %cst_6 = arith.constant 0.000000e+00 : f32
    %7 = vector.broadcast %cst_6 : f32 to vector<8x256xf32>
    %8 = arith.maximumf %6, %7 : vector<8x256xf32>
    %c0_7 = arith.constant 0 : index
    %c0_8 = arith.constant 0 : index
    %c0_9 = arith.constant 0 : index
    %9 = vector.load %arg5[%c0_7, %c0_8, %c0_9] : memref<1x8x256xf32, #tpu.memory_space<vmem>>, vector<1x8x256xf32>
    %10 = vector.shape_cast %9 : vector<1x8x256xf32> to vector<8x256xf32>
    %11 = vector.shape_cast %8 : vector<8x256xf32> to vector<1x8x256xf32>
    tpu.vector_store %arg5[%c0_7, %c0_8, %c0_9], %11 {strides = array<i32>} : memref<1x8x256xf32, #tpu.memory_space<vmem>>, vector<1x8x256xf32>,
    return
  }
  func.func @transform_0(%arg0: i32, %arg1: i32) -> (i32, i32, i32) {
    %c0_i32 = arith.constant 0 : i32
    %c0_i32_0 = arith.constant 0 : i32
    return %arg0, %c0_i32, %arg1 : i32, i32, i32
  }
  func.func @transform_1(%arg0: i32, %arg1: i32) -> (i32, i32) {
    %c0_i32 = arith.constant 0 : i32
    %c0_i32_0 = arith.constant 0 : i32
    %c0_i32_1 = arith.constant 0 : i32
    return %c0_i32, %c0_i32_0 : i32, i32
  }
  func.func @transform_2(%arg0: i32, %arg1: i32) -> (i32, i32) {
    %c0_i32 = arith.constant 0 : i32
    %c0_i32_0 = arith.constant 0 : i32
    %c0_i32_1 = arith.constant 0 : i32
    return %c0_i32, %c0_i32_0 : i32, i32
  }
  func.func @transform_3(%arg0: i32, %arg1: i32) -> (i32, i32, i32) {
    %c0_i32 = arith.constant 0 : i32
    %c0_i32_0 = arith.constant 0 : i32
    return %arg0, %c0_i32, %arg1 : i32, i32, i32
  }
}

</mosaic_0001>

<bundles_post_ra>
// kernel: _forward_impl.1
= control target key start
LH: loop header
LB: loop body
LE: loop exit
PB: predicated region body
PF: predicated region fallthrough
CT: control target
= control target key end

     0   :  { %s481_s12 = smov 0   ;;  %s483_s13 = smov 0   ;;  %s520_s0 = inlined_call_operand.vmem [shape: f32[2,4,256], index: 0, kind: input, shape index: {}]   ;;  %s521_s1 = inlined_call_operand.vmem [shape: f32[8,4], index: 1, kind: input, shape index: {}]   ;;  %s522_s2 = inlined_call_operand.vmem [shape: f32[8,1], index: 2, kind: input, shape index: {}]   ;;  %s523_s3 = inlined_call_operand.vmem [shape: f32[2,8,256], index: 3, kind: output, shape index: {}]  }
   0x1   :  { %s485_s14 = smov 0  }
   0x2 LB: > { %s25_s15 = sadd.s32 1, %s453_s13  ;;  %p395_p0 = scmp.ge.s32.totalorder %s457_s14, 1  ;;  %s457_s14 = sphi %s485_s14, %s13_s14   ;;  %s453_s13 = sphi %s483_s13, %s525_s13   ;;  %s449_s12 = sphi %s481_s12, %s524_s12  }
   0x3   : > { %p27_p1 = scmp.ge.s32.totalorder %s25_s15, 2  ;;  %p158_p2 = scmp.lt.s32.totalorder %s457_s14, 3 }
   0x5   : > { %s527_s15 = smov (%p27_p1, %s25_s15), 0  ;;  %p159_p3 = pnand %p395_p0, %p158_p2 }
   0x6   : > { %p191_p4 = scmp.lt.s32.totalorder (!%p159_p3), %s449_s12, 1  ;;  %v459_v0 = vmov (!%p159_p3), 0.0   ;;  %v460_v1 = vmov (!%p159_p3), 0   ;;  %v212_v2 = vld [vmem:[%s522_s2] sm:$0xff] (!%p159_p3)  ;;  %vm224_vm0 = vcmask (!%p159_p3), 1043456   ;;  %vm220_vm1 = vcmask (!%p159_p3), 31744  }
   0x7   : > { %162 = sbr.rel (%p159_p3) target bundleno = 240 (0xf0), region = 32  ;;  %293 = vmatprep.mubr.f32.mxu0 (!%p159_p3), %v459_v0  ;;  %433 = vset.pattern.permute.xlu0 (!%p159_p3), %v460_v1  ;;  %v210_v5 = vld [vmem:[%s521_s1] sm:$0xff] (!%p159_p3) }
   0x8   : > { %215 = vperm.xlu0 (!%p159_p3), %433, %v212_v2  }
   0xe   : > { %s529_s12 = smov (!%p191_p4, %s449_s12), 1 }
   0xf   : > { %s405_s18 = sshll.u32 %s529_s12, 3  ;;  %s406_s24 = sshll.u32 %s529_s12, 4 }
  0x10   : > { %s198_s21 = scalar_lea.vmem %s520_s0, %s405_s18  ;;  %s208_s27 = scalar_lea.vmem %s523_s3, %s406_s24 }
  0x11   : > { %v211_v3 = vld [vmem:[%s198_s21] sm:$0xff] }
  0x12   : > { %v219_v4 = vcombine.high %v211_v3, %v211_v3 }
  0x14   : > { %400 = vmatprep.subr.msk.mxu0 %vm224_vm0, %v219_v4 }
  0x15   : > { %401 = vmatpush1.msk.msra.mxu0 %vm224_vm0, %v211_v3 }
  0x16   : > { %402 = vmatmul.mubr.msk.f32.vlgmr.msra.gmra.mrb[0].mxu0 %vm220_vm1, %v210_v5 }
  0x87   : > { %v216_v6 = vpop.permute.xlu0 %215 }
  0xe9   : > { %v295_v7 = vpop.f32.mrb[0].mxu0 }
  0xea   : > { %v296_v8 = vadd.f32 %v295_v7, %v216_v6  ;;  %v297_v9 = vpop.f32.mrb[1].mxu0 }
  0xeb   : > { %v298_v10 = vadd.f32 %v297_v9, %v216_v6 }
  0xec   : > { %v300_v11 = vmax.f32 %v296_v8, 0.0 }
  0xed   : > { %v301_v12 = vmax.f32 %v298_v10, 0.0 }
  0xee   : > { %302 = vst [vmem:[%s208_s27] sm:$0xff] %v300_v11 }
  0xef   : > { %303 = vst [vmem:[%s208_s27 + $0x8] sm:$0xff] %v301_v12 }
  0xf0 PF: > { %s13_s14 = sadd.s32 1, %s457_s14   ;;  %s524_s12 = smov %s453_s13 }
  0xf1   : > { %p10_p5 = scmp.ge.s32.totalorder %s13_s14, 4   ;;  %s525_s13 = smov %s527_s15 }
  0xf3   :  { %12 = sbr.rel (!%p10_p5) target bundleno = 2 (0x2), region = 62 }

</bundles_post_ra>
